<compile_context>
chip_gen: v7x
topology: tpu7x:2x2x1
jax: 0.10.0
libtpu: 0.0.40
codegen_flags: <defaults>
</compile_context>

<pallas_src>
import jax
import jax.numpy as jnp
from jax import lax
from jax.experimental import pallas as pl
from jax.experimental.pallas import tpu as pltpu

NUM_CLASSES = 4
H1 = 64
H2 = 32
LANE = 128  # lane width / padded hidden width
TB_CAP = 1024  # batch-tile cap (working set ~11 MiB -> safe on v5e/v6e/v7x)


def _round_up(n, m):
    return (n + m - 1) // m * m


def _pick_batch_tile(b_pad, cap=TB_CAP):
    """Largest multiple-of-8 divisor of b_pad that is <= cap, preferring a
    grid of >= 2 steps (megacore sharding on v7x) when the batch allows it."""
    if b_pad <= 8:
        return b_pad
    limit = min(cap, max(8, (b_pad // 2) // 8 * 8))
    n = b_pad // 8
    best = 1
    d = 1
    while d * d <= n:
        if n % d == 0:
            for cand in (d, n // d):
                if cand * 8 <= limit and cand > best:
                    best = cand
        d += 1
    return best * 8


def _mlp_logsoftmax_kernel(x_ref, w1_ref, w2_ref, w3_ref, b_ref, out_ref):
    """Fused padded MLP + LogSoftmax for one batch tile.

    x_ref  : (TB, D)    float32   (cast to bf16 in-kernel)
    w1_ref : (D, 128)   bfloat16  (cols >= 64 are zero)
    w2_ref : (128, 128) bfloat16  (rows >= 64 / cols >= 32 are zero)
    w3_ref : (128, 128) bfloat16  (rows >= 32 / cols >= 4  are zero)
    b_ref  : (8, 128)   float32   row0=b1, row1=b2, row2=b3 (zero-padded)
    out_ref: (TB, 128)  bfloat16  lane-dense; only the first 4 cols are real
    """
    # In-kernel f32 -> bf16 cast of the streamed input (VPU slot has slack).
    x = x_ref[...].astype(jnp.bfloat16)
    b = b_ref[...]

    # Layer 1: Linear(D, 64) + ReLU  (bf16 operands, f32 accumulate)
    h1 = jnp.dot(x, w1_ref[...], preferred_element_type=jnp.float32) + b[0:1, :]
    h1 = jnp.maximum(h1, 0.0)
    # TODO(synk): Dropout(0.2) omitted (inference / eval semantics -> identity).

    # Layer 2: Linear(64, 32) + ReLU (padded rows/cols stay exactly zero)
    h2 = jnp.dot(h1.astype(jnp.bfloat16), w2_ref[...],
                 preferred_element_type=jnp.float32) + b[1:2, :]
    h2 = jnp.maximum(h2, 0.0)

    # Layer 3: Linear(32, 4)
    logits = jnp.dot(h2.astype(jnp.bfloat16), w3_ref[...],
                     preferred_element_type=jnp.float32) + b[2:3, :]

    # LogSoftmax over dim=1, masked to the first NUM_CLASSES lanes.
    cols = lax.broadcasted_iota(jnp.int32, logits.shape, 1)
    valid = cols < NUM_CLASSES
    logits = jnp.where(valid, logits, -jnp.inf)

    m = jnp.max(logits, axis=1, keepdims=True)
    shifted = logits - m                       # -inf on padded lanes
    lse = jnp.log(jnp.sum(jnp.exp(shifted), axis=1, keepdims=True))
    out_ref[...] = jnp.where(valid, shifted - lse, 0.0).astype(out_ref.dtype)


def prepare_params(params):
    """One-time padding / packing / casting of torch-layout params."""
    w1, b1, w2, b2, w3, b3 = params
    d = w1.shape[0]

    w1p = jnp.zeros((d, LANE), jnp.float32).at[:, :H1].set(w1).astype(jnp.bfloat16)
    w2p = jnp.zeros((LANE, LANE), jnp.float32).at[:H1, :H2].set(w2).astype(jnp.bfloat16)
    w3p = jnp.zeros((LANE, LANE), jnp.float32).at[:H2, :NUM_CLASSES].set(w3).astype(jnp.bfloat16)

    b_all = jnp.zeros((8, LANE), jnp.float32)
    b_all = b_all.at[0, :H1].set(b1.reshape(-1))
    b_all = b_all.at[1, :H2].set(b2.reshape(-1))
    b_all = b_all.at[2, :NUM_CLASSES].set(b3.reshape(-1))
    return w1p, w2p, w3p, b_all


@jax.jit
def mobilenetv3_forward(x, prepared_params):
    """x: [B, C, H, W] float32 (NCHW, like the PyTorch module). Returns [B, 4] f32."""
    w1p, w2p, w3p, b_all = prepared_params

    b_sz = x.shape[0]
    d = 1
    for s in x.shape[1:]:
        d *= s
    x_flat = x.reshape(b_sz, d)                     # == torch x.view(B, -1)

    # Pad the batch only to the next multiple of 8 sublanes (<= 7 wasted rows),
    # then tile with an exact divisor of the padded batch.
    b_pad = _round_up(b_sz, 8)
    if b_pad != b_sz:
        x_flat = jnp.pad(x_flat, ((0, b_pad - b_sz), (0, 0)))
    tb = _pick_batch_tile(b_pad)

    grid = (b_pad // tb,)

    cost = pl.CostEstimate(
        # padded 128-wide matmuls (what the MXU actually does)
        flops=2 * b_pad * (d * LANE + LANE * LANE + LANE * LANE),
        transcendentals=b_pad * LANE,              # exp over all 128 lanes
        bytes_accessed=(b_pad * d * 4              # streamed f32 input
                        + d * LANE * 2             # resident bf16 W1
                        + 2 * LANE * LANE * 2      # resident bf16 W2, W3
                        + 8 * LANE * 4             # packed biases
                        + b_pad * LANE * 2),       # bf16 lane-dense output slab
    )

    out = pl.pallas_call(
        _mlp_logsoftmax_kernel,
        out_shape=jax.ShapeDtypeStruct((b_pad, LANE), jnp.bfloat16),
        grid=grid,
        in_specs=[
            pl.BlockSpec((tb, d), lambda i: (i, 0)),         # x tile streams (f32)
            pl.BlockSpec((d, LANE), lambda i: (0, 0)),       # W1 resident
            pl.BlockSpec((LANE, LANE), lambda i: (0, 0)),    # W2 resident
            pl.BlockSpec((LANE, LANE), lambda i: (0, 0)),    # W3 resident
            pl.BlockSpec((8, LANE), lambda i: (0, 0)),       # packed biases
        ],
        out_specs=pl.BlockSpec((tb, LANE), lambda i: (i, 0)),
        compiler_params=pltpu.CompilerParams(
            dimension_semantics=("parallel",),
            vmem_limit_bytes=32 * 1024 * 1024,
        ),
        cost_estimate=cost,
    )(x_flat, w1p, w2p, w3p, b_all)

    return out[:b_sz, :NUM_CLASSES].astype(jnp.float32)


def init_params(key, input_size):
    """Deterministic init mimicking nn.Linear's uniform(-1/sqrt(fan_in), 1/sqrt(fan_in))."""
    dims = [(input_size, H1), (H1, H2), (H2, NUM_CLASSES)]
    params = []
    for i, (fan_in, fan_out) in enumerate(dims):
        kw, kb, key = jax.random.split(jax.random.fold_in(key, i), 3)
        bound = 1.0 / jnp.sqrt(float(fan_in))
        w = jax.random.uniform(kw, (fan_in, fan_out), jnp.float32, -bound, bound)
        bias = jax.random.uniform(kb, (1, fan_out), jnp.float32, -bound, bound)
        params += [w, bias]
    return tuple(params)


def _reference_forward(x, params):
    """Pure-JAX f32 reference (eval-mode)."""
    w1, b1, w2, b2, w3, b3 = params
    h = x.reshape(x.shape[0], -1)
    h = jnp.maximum(h @ w1 + b1, 0.0)
    h = jnp.maximum(h @ w2 + b2, 0.0)
    logits = h @ w3 + b3
    return jax.nn.log_softmax(logits, axis=1)


if __name__ == "__main__":
    key = jax.random.PRNGKey(0)
    kx, kp = jax.random.split(key)

    # Small shapes: batch=2, channels=4, spatial=16x16 -> input_size = 1024
    B, C, H, W = 2, 4, 16, 16
    input_size = C * H * W

    x = jax.random.normal(kx, (B, C, H, W), dtype=jnp.float32)
    raw_params = init_params(kp, input_size)
    params = prepare_params(raw_params)

    out = mobilenetv3_forward(x, params)
    out = jax.block_until_ready(out)

    assert out.shape == (B, NUM_CLASSES), out.shape
    # log-softmax rows should exponentiate-sum to ~1 (bf16 storage -> loose atol)
    assert jnp.allclose(jnp.sum(jnp.exp(out), axis=1), 1.0, atol=2e-2)
    # match the f32 reference (bf16 matmul operands + bf16 output -> loose tolerance)
    ref = _reference_forward(x, raw_params)
    assert jnp.allclose(out, ref, atol=7.5e-2), jnp.max(jnp.abs(out - ref))
    print("KERNEL_OK")
</pallas_src>

<mosaic_0001>
module attributes {stable_mosaic.version = 11 : i64} {
  func.func @_mlp_logsoftmax_kernel(%arg0: i32, %arg1: memref<8x1024xf32, #tpu.memory_space<vmem>>, %arg2: memref<1024x128xbf16, #tpu.memory_space<vmem>>, %arg3: memref<128x128xbf16, #tpu.memory_space<vmem>>, %arg4: memref<128x128xbf16, #tpu.memory_space<vmem>>, %arg5: memref<8x128xf32, #tpu.memory_space<vmem>>, %arg6: memref<8x128xbf16, #tpu.memory_space<vmem>>) attributes {dimension_semantics = [#tpu.dimension_semantics<parallel>], iteration_bounds = array<i64: 1>, scalar_prefetch = 0 : i64, scratch_operands = 0 : i64, tpu.core_type = #tpu.core_type<tc>, window_params = [{transform_indices = @transform_0, window_bounds = array<i64: 8, 1024>}, {pipeline_mode = #tpu.pipeline_mode<synchronous>, transform_indices = @transform_1, window_bounds = array<i64: 1024, 128>}, {pipeline_mode = #tpu.pipeline_mode<synchronous>, transform_indices = @transform_2, window_bounds = array<i64: 128, 128>}, {pipeline_mode = #tpu.pipeline_mode<synchronous>, transform_indices = @transform_3, window_bounds = array<i64: 128, 128>}, {pipeline_mode = #tpu.pipeline_mode<synchronous>, transform_indices = @transform_4, window_bounds = array<i64: 8, 128>}, {transform_indices = @transform_5, window_bounds = array<i64: 8, 128>}]} {
    %c0 = arith.constant 0 : index
    %c0_0 = arith.constant 0 : index
    %0 = vector.load %arg1[%c0, %c0_0] : memref<8x1024xf32, #tpu.memory_space<vmem>>, vector<8x1024xf32>
    %1 = arith.truncf %0 : vector<8x1024xf32> to vector<8x1024xbf16>
    %c0_1 = arith.constant 0 : index
    %c0_2 = arith.constant 0 : index
    %2 = vector.load %arg5[%c0_1, %c0_2] : memref<8x128xf32, #tpu.memory_space<vmem>>, vector<8x128xf32>
    %c0_3 = arith.constant 0 : index
    %c0_4 = arith.constant 0 : index
    %3 = vector.load %arg2[%c0_3, %c0_4] : memref<1024x128xbf16, #tpu.memory_space<vmem>>, vector<1024x128xbf16>
    %cst = arith.constant dense<0.000000e+00> : vector<8x128xf32>
    %4 = tpu.matmul %1, %3, %cst {dimension_numbers = #tpu.dot_dimension_numbers<[1], [0], [0], [1], [0, 0, 1, 1], [], []>} : vector<8x1024xbf16>, vector<1024x128xbf16>, vector<8x128xf32> -> vector<8x128xf32>
    %5 = vector.extract_strided_slice %2 {offsets = [0, 0], sizes = [1, 128], strides = [1, 1]} : vector<8x128xf32> to vector<1x128xf32>
    %6 = vector.broadcast %5 : vector<1x128xf32> to vector<8x128xf32>
    %7 = arith.addf %4, %6 : vector<8x128xf32>
    %cst_5 = arith.constant 0.000000e+00 : f32
    %8 = vector.broadcast %cst_5 : f32 to vector<8x128xf32>
    %9 = arith.maximumf %7, %8 : vector<8x128xf32>
    %10 = arith.truncf %9 : vector<8x128xf32> to vector<8x128xbf16>
    %c0_6 = arith.constant 0 : index
    %c0_7 = arith.constant 0 : index
    %11 = vector.load %arg3[%c0_6, %c0_7] : memref<128x128xbf16, #tpu.memory_space<vmem>>, vector<128x128xbf16>
    %cst_8 = arith.constant dense<0.000000e+00> : vector<8x128xf32>
    %12 = tpu.matmul %10, %11, %cst_8 {dimension_numbers = #tpu.dot_dimension_numbers<[1], [0], [0], [1], [0, 0, 1, 1], [], []>} : vector<8x128xbf16>, vector<128x128xbf16>, vector<8x128xf32> -> vector<8x128xf32>
    %13 = vector.extract_strided_slice %2 {offsets = [1, 0], sizes = [1, 128], strides = [1, 1]} : vector<8x128xf32> to vector<1x128xf32>
    %14 = vector.broadcast %13 : vector<1x128xf32> to vector<8x128xf32>
    %15 = arith.addf %12, %14 : vector<8x128xf32>
    %cst_9 = arith.constant 0.000000e+00 : f32
    %16 = vector.broadcast %cst_9 : f32 to vector<8x128xf32>
    %17 = arith.maximumf %15, %16 : vector<8x128xf32>
    %18 = arith.truncf %17 : vector<8x128xf32> to vector<8x128xbf16>
    %c0_10 = arith.constant 0 : index
    %c0_11 = arith.constant 0 : index
    %19 = vector.load %arg4[%c0_10, %c0_11] : memref<128x128xbf16, #tpu.memory_space<vmem>>, vector<128x128xbf16>
    %cst_12 = arith.constant dense<0.000000e+00> : vector<8x128xf32>
    %20 = tpu.matmul %18, %19, %cst_12 {dimension_numbers = #tpu.dot_dimension_numbers<[1], [0], [0], [1], [0, 0, 1, 1], [], []>} : vector<8x128xbf16>, vector<128x128xbf16>, vector<8x128xf32> -> vector<8x128xf32>
    %21 = vector.extract_strided_slice %2 {offsets = [2, 0], sizes = [1, 128], strides = [1, 1]} : vector<8x128xf32> to vector<1x128xf32>
    %22 = vector.broadcast %21 : vector<1x128xf32> to vector<8x128xf32>
    %23 = arith.addf %20, %22 : vector<8x128xf32>
    %24 = tpu.iota {dimensions = array<i32: 1>} : vector<8x128xi32>
    %c4_i32 = arith.constant 4 : i32
    %25 = vector.broadcast %c4_i32 : i32 to vector<8x128xi32>
    %26 = arith.cmpi slt, %24, %25 : vector<8x128xi32>
    %cst_13 = arith.constant 0xFF800000 : f32
    %27 = vector.broadcast %cst_13 : f32 to vector<8x128xf32>
    %28 = arith.select %26, %23, %27 : vector<8x128xi1>, vector<8x128xf32>
    %cst_14 = arith.constant dense<0xFF800000> : vector<8xf32>
    %29 = vector.multi_reduction <maximumf>, %28, %cst_14 [1] : vector<8x128xf32> to vector<8xf32>
    %30 = vector.shape_cast %29 : vector<8xf32> to vector<8x1xf32>
    %31 = vector.broadcast %30 : vector<8x1xf32> to vector<8x128xf32>
    %32 = arith.subf %28, %31 : vector<8x128xf32>
    %33 = math.exp %32 : vector<8x128xf32>
    %cst_15 = arith.constant dense<0.000000e+00> : vector<8xf32>
    %34 = vector.multi_reduction <add>, %33, %cst_15 [1] : vector<8x128xf32> to vector<8xf32>
    %35 = vector.shape_cast %34 : vector<8xf32> to vector<8x1xf32>
    %36 = math.log %35 : vector<8x1xf32>
    %37 = vector.broadcast %36 : vector<8x1xf32> to vector<8x128xf32>
    %38 = arith.subf %32, %37 : vector<8x128xf32>
    %cst_16 = arith.constant 0.000000e+00 : f32
    %39 = vector.broadcast %cst_16 : f32 to vector<8x128xf32>
    %40 = arith.select %26, %38, %39 : vector<8x128xi1>, vector<8x128xf32>
    %41 = arith.truncf %40 : vector<8x128xf32> to vector<8x128xbf16>
    %c0_17 = arith.constant 0 : index
    %c0_18 = arith.constant 0 : index
    %42 = vector.load %arg6[%c0_17, %c0_18] : memref<8x128xbf16, #tpu.memory_space<vmem>>, vector<8x128xbf16>
    tpu.vector_store %arg6[%c0_17, %c0_18], %41 {strides = array<i32>} : memref<8x128xbf16, #tpu.memory_space<vmem>>, vector<8x128xbf16>,
    return
  }
  func.func @transform_0(%arg0: i32) -> (i32, i32) {
    %c0_i32 = arith.constant 0 : i32
    %c0_i32_0 = arith.constant 0 : i32
    return %arg0, %c0_i32 : i32, i32
  }
  func.func @transform_1(%arg0: i32) -> (i32, i32) {
    %c0_i32 = arith.constant 0 : i32
    %c0_i32_0 = arith.constant 0 : i32
    %c0_i32_1 = arith.constant 0 : i32
    return %c0_i32, %c0_i32_0 : i32, i32
  }
  func.func @transform_2(%arg0: i32) -> (i32, i32) {
    %c0_i32 = arith.constant 0 : i32
    %c0_i32_0 = arith.constant 0 : i32
    %c0_i32_1 = arith.constant 0 : i32
    return %c0_i32, %c0_i32_0 : i32, i32
  }
  func.func @transform_3(%arg0: i32) -> (i32, i32) {
    %c0_i32 = arith.constant 0 : i32
    %c0_i32_0 = arith.constant 0 : i32
    %c0_i32_1 = arith.constant 0 : i32
    return %c0_i32, %c0_i32_0 : i32, i32
  }
  func.func @transform_4(%arg0: i32) -> (i32, i32) {
    %c0_i32 = arith.constant 0 : i32
    %c0_i32_0 = arith.constant 0 : i32
    %c0_i32_1 = arith.constant 0 : i32
    return %c0_i32, %c0_i32_0 : i32, i32
  }
  func.func @transform_5(%arg0: i32) -> (i32, i32) {
    %c0_i32 = arith.constant 0 : i32
    %c0_i32_0 = arith.constant 0 : i32
    return %arg0, %c0_i32 : i32, i32
  }
}

</mosaic_0001>

<bundles_post_ra>
// kernel: mobilenetv3_forward.1
= control target key start
LH: loop header
LB: loop body
LE: loop exit
PB: predicated region body
PF: predicated region fallthrough
CT: control target
= control target key end

     0   :  { %10 = vsyncpa [#allocation3], 0  ;;  %s1309_s18 = smov [#allocation2]   ;;  %s1454_s0 = inlined_call_operand.vmem [shape: f32[8,1024], index: 0, kind: input, shape index: {}]   ;;  %s1455_s1 = inlined_call_operand.hbm [shape: bf16[1024,128], index: 1, kind: input, shape index: {}]   ;;  %s1456_s2 = inlined_call_operand.vmem [shape: bf16[128,128], index: 2, kind: input, shape index: {}]   ;;  %s1457_s3 = inlined_call_operand.vmem [shape: bf16[128,128], index: 3, kind: input, shape index: {}]   ;;  %s1458_s4 = inlined_call_operand.vmem [shape: f32[8,128], index: 4, kind: input, shape index: {}]   ;;  %s1459_s5 = inlined_call_operand.vmem [shape: bf16[8,128], index: 5, kind: output, shape index: {}]  }
   0x1   :  { %s18_s19 = sshll.u32 %s1309_s18, 4  ;;  %s1285_s22 = scalar_lea.hbm %s1455_s1, 8192  ;;  %s19_s19 = int_to_ptr.vmem [resolvable:$true] %s18_s19 }
   0x2   :  { %p1286_p0 = scmp.ne.s32.totalorder %s1455_s1, %s1285_s22  ;;  %p1289_p1 = scmp.lt.u32.totalorder %s1285_s22, %s1455_s1 }
   0x4   :  { %p1291_p2 = pnand %p1289_p1, %p1286_p0 }
   0x6   :  { %1294 = shalt.err (!%p1291_p2)
}
   0x7   :  { %s1295_s27 = scalar_lea.vmem %s19_s19, 8192  ;;  %p1300_p4 = scmp.lt.s32.totalorder %s19_s19, %s19_s19 }
   0x8   :  { %p1296_p3 = scmp.ne.s32.totalorder %s19_s19, %s1295_s27  ;;  %p1301_p5 = scmp.lt.s32.totalorder %s1295_s27, %s1295_s27 }
   0xa   :  { %p1302_p6 = por %p1301_p5, %p1300_p4 }
   0xc   :  { %p1303_p7 = pnand %p1302_p6, %p1296_p3 }
   0xe   :  { %1306 = shalt.err (!%p1303_p7)
}
   0xf   :  { %s1310_s28 = smov 64   ;;  %s1311_s29 = smov 4  }
  0x10   :  { %24 = dma.hbm_to_vmem [thread:$0]  %s1455_s1, 8192, %s19_s19, [#allocation3], %s1310_s28, %s1310_s28, %s1311_s29  }
  0x11   :  { %1307 = dma.done.wait [#allocation3], 8192  }
  0x12   :  { %1308 = vsyncadd [#allocation3], 4294959104  ;;  %v1201_v0 = vld [vmem:[#allocation2 + $0x40] sm:$0xff]   ;;  %v1205_v4 = vld [vmem:[#allocation2 + $0x48] sm:$0xff]   ;;  %vm1313_vm0 = vmmov 0  }
  0x13   :  { %v1202_v1 = vld [vmem:[#allocation2 + $0xc0] sm:$0xff]   ;;  %1050 = vmatprep.subr.bf16.mxu0 %v1201_v0  ;;  %v1206_v5 = vld [vmem:[#allocation2 + $0xc8] sm:$0xff]   ;;  %v1209_v8 = vld [vmem:[#allocation2 + $0x50] sm:$0xff]  }
  0x14   :  { %v1203_v2 = vld [vmem:[#allocation2] sm:$0xff]   ;;  %1072 = vmatprep.subr.bf16.mxu1 %v1202_v1  ;;  %v1207_v6 = vld [vmem:[#allocation2 + $0x8] sm:$0xff]   ;;  %v1210_v9 = vld [vmem:[#allocation2 + $0xd0] sm:$0xff]  }
  0x15   :  { %v1204_v3 = vld [vmem:[#allocation2 + $0x80] sm:$0xff]   ;;  %1051 = vmatpush3.bf16.msra.mxu0 %v1203_v2  ;;  %v1208_v7 = vld [vmem:[#allocation2 + $0x88] sm:$0xff]   ;;  %v1211_v10 = vld [vmem:[#allocation2 + $0x10] sm:$0xff]  }
  0x16   :  { %1073 = vmatpush3.bf16.msra.mxu1 %v1204_v3  ;;  %1052 = vmatprep.subr.bf16.mxu0 %v1205_v4  ;;  %v1212_v11 = vld [vmem:[#allocation2 + $0x90] sm:$0xff]   ;;  %v1213_v12 = vld [vmem:[#allocation2 + $0x58] sm:$0xff]   ;;  %v1217_v16 = vld [vmem:[#allocation2 + $0x60] sm:$0xff]  }
  0x17   :  { %1074 = vmatprep.subr.bf16.mxu1 %v1206_v5  ;;  %v1214_v13 = vld [vmem:[#allocation2 + $0xd8] sm:$0xff]   ;;  %v1218_v17 = vld [vmem:[#allocation2 + $0xe0] sm:$0xff]   ;;  %v1221_v20 = vld [vmem:[#allocation2 + $0x68] sm:$0xff]  }
  0x18   :  { %v1215_v14 = vld [vmem:[#allocation2 + $0x18] sm:$0xff]   ;;  %v1219_v18 = vld [vmem:[#allocation2 + $0x20] sm:$0xff]   ;;  %v1222_v21 = vld [vmem:[#allocation2 + $0xe8] sm:$0xff]  }
  0x19   :  { %1053 = vmatpush3.bf16.msra.mxu0 %v1207_v6  ;;  %v1216_v15 = vld [vmem:[#allocation2 + $0x98] sm:$0xff]   ;;  %v1220_v19 = vld [vmem:[#allocation2 + $0xa0] sm:$0xff]   ;;  %v1223_v22 = vld [vmem:[#allocation2 + $0x28] sm:$0xff]  }
  0x1a   :  { %1075 = vmatpush3.bf16.msra.mxu1 %v1208_v7  ;;  %1054 = vmatprep.subr.bf16.mxu0 %v1209_v8  ;;  %v1224_v23 = vld [vmem:[#allocation2 + $0xa8] sm:$0xff]   ;;  %v1225_v24 = vld [vmem:[#allocation2 + $0x70] sm:$0xff]   ;;  %v1229_v28 = vld [vmem:[#allocation2 + $0x78] sm:$0xff]  }
  0x1b   :  { %1076 = vmatprep.subr.bf16.mxu1 %v1210_v9  ;;  %v1226_v25 = vld [vmem:[#allocation2 + $0xf0] sm:$0xff]   ;;  %v1230_v29 = vld [vmem:[#allocation2 + $0xf8] sm:$0xff]   ;;  %v36_v32 = vld [vmem:[%s1454_s0 + $0x8] sm:$0xff] }
  0x1c   :  { %v1227_v26 = vld [vmem:[#allocation2 + $0x30] sm:$0xff]   ;;  %v1231_v30 = vld [vmem:[#allocation2 + $0x38] sm:$0xff]   ;;  %v35_v34 = vld [vmem:[%s1454_s0] sm:$0xff]  ;;  %v44_v35 = vpack.c.bf16 %v36_v32, %v36_v32 }
  0x1d   :  { %1055 = vmatpush3.bf16.msra.mxu0 %v1211_v10  ;;  %v1228_v27 = vld [vmem:[#allocation2 + $0xb0] sm:$0xff]   ;;  %v1232_v31 = vld [vmem:[#allocation2 + $0xb8] sm:$0xff]   ;;  %v43_v37 = vpack.c.bf16 %v35_v34, %v35_v34  ;;  %v1233_v40 = vld [vmem:[#allocation2 + $0x140] sm:$0xff]  }
  0x1e   :  { %1077 = vmatpush3.bf16.msra.mxu1 %v1212_v11  ;;  %1056 = vmatprep.subr.bf16.mxu0 %v1213_v12  ;;  %v38_v33 = vld [vmem:[%s1454_s0 + $0x18] sm:$0xff]  ;;  %v37_v38 = vld [vmem:[%s1454_s0 + $0x10] sm:$0xff]  ;;  %v1234_v41 = vld [vmem:[#allocation2 + $0x1c0] sm:$0xff]  }
  0x1f   :  { %1078 = vmatprep.subr.bf16.mxu1 %v1214_v13  ;;  %v46_v36 = vpack.c.bf16 %v38_v33, %v38_v33  ;;  %v45_v39 = vpack.c.bf16 %v37_v38, %v37_v38  ;;  %600 = vmatprep.mubr.bf16.mxu0 %v44_v35  ;;  %v1235_v42 = vld [vmem:[#allocation2 + $0x100] sm:$0xff]   ;;  %v1237_v44 = vld [vmem:[#allocation2 + $0x148] sm:$0xff]   ;;  %v1241_v48 = vld [vmem:[#allocation2 + $0x150] sm:$0xff]  }
  0x20   :  { %v1236_v43 = vld [vmem:[#allocation2 + $0x180] sm:$0xff]   ;;  %v1238_v45 = vld [vmem:[#allocation2 + $0x1c8] sm:$0xff]   ;;  %v1242_v49 = vld [vmem:[#allocation2 + $0x1d0] sm:$0xff]  }
  0x21   :  { %1057 = vmatpush3.bf16.msra.mxu0 %v1215_v14  ;;  %640 = vmatprep.mubr.bf16.mxu1 %v46_v36  ;;  %v1239_v46 = vld [vmem:[#allocation2 + $0x108] sm:$0xff]   ;;  %v1243_v50 = vld [vmem:[#allocation2 + $0x110] sm:$0xff]   ;;  %v1245_v52 = vld [vmem:[#allocation2 + $0x158] sm:$0xff]  }
  0x22   :  { %1079 = vmatpush3.bf16.msra.mxu1 %v1216_v15  ;;  %1058 = vmatprep.subr.bf16.mxu0 %v1217_v16  ;;  %v1240_v47 = vld [vmem:[#allocation2 + $0x188] sm:$0xff]   ;;  %v1244_v51 = vld [vmem:[#allocation2 + $0x190] sm:$0xff]   ;;  %v1246_v53 = vld [vmem:[#allocation2 + $0x1d8] sm:$0xff]  }
  0x23   :  { %1080 = vmatprep.subr.bf16.mxu1 %v1218_v17  ;;  %v1247_v54 = vld [vmem:[#allocation2 + $0x118] sm:$0xff]   ;;  %v1249_v56 = vld [vmem:[#allocation2 + $0x160] sm:$0xff]   ;;  %v1253_v60 = vld [vmem:[#allocation2 + $0x168] sm:$0xff]   ;;  %v1312_v17 = vmov 0.0  }
  0x24   :  { %v1248_v55 = vld [vmem:[#allocation2 + $0x198] sm:$0xff]   ;;  %v1250_v57 = vld [vmem:[#allocation2 + $0x1e0] sm:$0xff]   ;;  %v1254_v61 = vld [vmem:[#allocation2 + $0x1e8] sm:$0xff]  }
  0x25   :  { %1059 = vmatpush3.bf16.msra.mxu0 %v1219_v18  ;;  %v1251_v58 = vld [vmem:[#allocation2 + $0x120] sm:$0xff]   ;;  %v1255_v62 = vld [vmem:[#allocation2 + $0x128] sm:$0xff]   ;;  %v1257_v0 = vld [vmem:[#allocation2 + $0x170] sm:$0xff]  }
  0x26   :  { %1081 = vmatpush3.bf16.msra.mxu1 %v1220_v19  ;;  %1060 = vmatprep.subr.bf16.mxu0 %v1221_v20  ;;  %v1252_v59 = vld [vmem:[#allocation2 + $0x1a0] sm:$0xff]   ;;  %v1256_v63 = vld [vmem:[#allocation2 + $0x1a8] sm:$0xff]   ;;  %v1258_v1 = vld [vmem:[#allocation2 + $0x1f0] sm:$0xff]  }
  0x27   :  { %1082 = vmatprep.subr.bf16.mxu1 %v1222_v21  ;;  %v1259_v2 = vld [vmem:[#allocation2 + $0x130] sm:$0xff]   ;;  %v1261_v4 = vld [vmem:[#allocation2 + $0x178] sm:$0xff]   ;;  %v40_v8 = vld [vmem:[%s1454_s0 + $0x28] sm:$0xff] }
  0x28   :  { %v1260_v3 = vld [vmem:[#allocation2 + $0x1b0] sm:$0xff]   ;;  %v1262_v5 = vld [vmem:[#allocation2 + $0x1f8] sm:$0xff]   ;;  %v48_v10 = vpack.c.bf16 %v40_v8, %v40_v8  ;;  %v39_v12 = vld [vmem:[%s1454_s0 + $0x20] sm:$0xff] }
  0x29   :  { %1061 = vmatpush3.bf16.msra.mxu0 %v1223_v22  ;;  %v1263_v6 = vld [vmem:[#allocation2 + $0x138] sm:$0xff]   ;;  %v41_v13 = vld [vmem:[%s1454_s0 + $0x30] sm:$0xff]  ;;  %v47_v14 = vpack.c.bf16 %v39_v12, %v39_v12  ;;  %v1265_v16 = vld [vmem:[%s1456_s2] sm:$0xff]  }
  0x2a   :  { %1083 = vmatpush3.bf16.msra.mxu1 %v1224_v23  ;;  %1062 = vmatprep.subr.bf16.mxu0 %v1225_v24  ;;  %v1264_v7 = vld [vmem:[#allocation2 + $0x1b8] sm:$0xff]   ;;  %v49_v15 = vpack.c.bf16 %v41_v13, %v41_v13  ;;  %v1266_v18 = vld [vmem:[%s1456_s2 + $0x8] sm:$0xff]   ;;  %v1267_v19 = vld [vmem:[%s1456_s2 + $0x10] sm:$0xff]  }
  0x2b   :  { %1084 = vmatprep.subr.bf16.mxu1 %v1226_v25  ;;  %v42_v9 = vld [vmem:[%s1454_s0 + $0x38] sm:$0xff]  ;;  %v1269_v21 = vld [vmem:[%s1456_s2 + $0x20] sm:$0xff]   ;;  %v1270_v22 = vld [vmem:[%s1456_s2 + $0x28] sm:$0xff]  }
  0x2c   :  { %v50_v11 = vpack.c.bf16 %v42_v9, %v42_v9  ;;  %v1268_v20 = vld [vmem:[%s1456_s2 + $0x18] sm:$0xff]   ;;  %v1271_v23 = vld [vmem:[%s1456_s2 + $0x30] sm:$0xff]   ;;  %v1273_v25 = vld [vmem:[%s1457_s3] sm:$0xff]  }
  0x2d   :  { %1063 = vmatpush3.bf16.msra.mxu0 %v1227_v26  ;;  %v1272_v24 = vld [vmem:[%s1456_s2 + $0x38] sm:$0xff]   ;;  %v1274_v26 = vld [vmem:[%s1457_s3 + $0x8] sm:$0xff]   ;;  %v51_v34 = vld [vmem:[%s1458_s4] sm:$0xff] }
  0x2e   :  { %1085 = vmatpush3.bf16.msra.mxu1 %v1228_v27  ;;  %1064 = vmatprep.subr.bf16.mxu0 %v1229_v28  ;;  %v1275_v27 = vld [vmem:[%s1457_s3 + $0x10] sm:$0xff]   ;;  %v1276_v28 = vld [vmem:[%s1457_s3 + $0x18] sm:$0xff]  }
  0x2f   :  { %1086 = vmatprep.subr.bf16.mxu1 %v1230_v29  ;;  %v1277_v29 = vld [vmem:[%s1457_s3 + $0x20] sm:$0xff]  }
  0x31   :  { %1065 = vmatpush3.bf16.msra.mxu0 %v1231_v30  ;;  %v1278_v30 = vld [vmem:[%s1457_s3 + $0x28] sm:$0xff]  }
  0x32   :  { %1087 = vmatpush3.bf16.msra.mxu1 %v1232_v31  ;;  %1094 = vmatprep.subr.bf16.mxu0 %v1233_v40  ;;  %v180_v31 = vlaneseq }
  0x33   :  { %1116 = vmatprep.subr.bf16.mxu1 %v1234_v41 }
  0x34   :  { %601 = vmatmul.mubr.bf16.vlgmr.msra.gmra.mrb[0].mxu0 %v43_v37  ;;  %v181_v32 = vshrl.u32 %v180_v31, 7 }
  0x35   :  { %641 = vmatmul.mubr.bf16.vlgmr.msra.gmra.mrb[0].mxu1 %v45_v39  ;;  %1095 = vmatpush3.bf16.msra.mxu0 %v1235_v42 }
  0x36   :  { %1117 = vmatpush3.bf16.msra.mxu1 %v1236_v43  ;;  %1096 = vmatprep.subr.bf16.mxu0 %v1237_v44  ;;  %v182_v33 = vsub.s32 0, %v181_v32  ;;  %v858_v9 = vsub.s32 2, %v181_v32 }
  0x37   :  { %1118 = vmatprep.subr.bf16.mxu1 %v1238_v45  ;;  %680 = vmatprep.mubr.bf16.mxu0 %v48_v10  ;;  %v949_v10 = vand.u32 127, %v180_v31 }
  0x38   :  { %720 = vmatprep.mubr.bf16.mxu1 %v50_v11  ;;  %v183_v37 = vrot.slane %v51_v34, %v182_v33  ;;  %v859_v11 = vrot.slane %v51_v34, %v858_v9 }
  0x39   :  { %1097 = vmatpush3.bf16.msra.mxu0 %v1239_v46  ;;  %vm950_vm1 = vcmp.lt.s32.totalorder %v949_v10, 4 }
  0x3a   :  { %1119 = vmatpush3.bf16.msra.mxu1 %v1240_v47  ;;  %1098 = vmatprep.subr.bf16.mxu0 %v1241_v48 }
  0x3b   :  { %1120 = vmatprep.subr.bf16.mxu1 %v1242_v49 }
  0x3d   :  { %1099 = vmatpush3.bf16.msra.mxu0 %v1243_v50 }
  0x3e   :  { %1121 = vmatpush3.bf16.msra.mxu1 %v1244_v51  ;;  %1100 = vmatprep.subr.bf16.mxu0 %v1245_v52 }
  0x3f   :  { %1122 = vmatprep.subr.bf16.mxu1 %v1246_v53 }
  0x41   :  { %1101 = vmatpush3.bf16.msra.mxu0 %v1247_v54 }
  0x42   :  { %1123 = vmatpush3.bf16.msra.mxu1 %v1248_v55  ;;  %1102 = vmatprep.subr.bf16.mxu0 %v1249_v56 }
  0x43   :  { %1124 = vmatprep.subr.bf16.mxu1 %v1250_v57 }
  0x45   :  { %1103 = vmatpush3.bf16.msra.mxu0 %v1251_v58 }
  0x46   :  { %1125 = vmatpush3.bf16.msra.mxu1 %v1252_v59  ;;  %1104 = vmatprep.subr.bf16.mxu0 %v1253_v60 }
  0x47   :  { %1126 = vmatprep.subr.bf16.mxu1 %v1254_v61 }
  0x49   :  { %1105 = vmatpush3.bf16.msra.mxu0 %v1255_v62  ;;  %v1279_v62 = vld [vmem:[%s1457_s3 + $0x30] sm:$0xff]  }
  0x4a   :  { %1127 = vmatpush3.bf16.msra.mxu1 %v1256_v63  ;;  %1106 = vmatprep.subr.bf16.mxu0 %v1257_v0  ;;  %v1280_v63 = vld [vmem:[%s1457_s3 + $0x38] sm:$0xff]   ;;  %v748_v0 = vsub.s32 1, %v181_v32 }
  0x4b   :  { %1128 = vmatprep.subr.bf16.mxu1 %v1258_v1 }
  0x4c   :  { %v749_v1 = vrot.slane %v51_v34, %v748_v0 }
  0x4d   :  { %1107 = vmatpush3.bf16.msra.mxu0 %v1259_v2 }
  0x4e   :  { %1129 = vmatpush3.bf16.msra.mxu1 %v1260_v3  ;;  %1108 = vmatprep.subr.bf16.mxu0 %v1261_v4 }
  0x4f   :  { %1130 = vmatprep.subr.bf16.mxu1 %v1262_v5 }
  0x51   :  { %1109 = vmatpush3.bf16.msra.mxu0 %v1263_v6 }
  0x52   :  { %1131 = vmatpush3.bf16.msra.mxu1 %v1264_v7  ;;  %1156 = vmatprep.subr.bf16.mxu0 %v1312_v17 }
  0x53   :  { %1176 = vmatprep.subr.bf16.mxu1 %v1312_v17 }
  0x54   :  { %681 = vmatmul.mubr.bf16.vlgmr.msra.gmra.mrb[4].mxu0 %v47_v14 }
  0x55   :  { %721 = vmatmul.mubr.bf16.vlgmr.msra.gmra.mrb[4].mxu1 %v49_v15  ;;  %1157 = vmatpush3.bf16.msra.mxu0 %v1265_v16 }
  0x56   :  { %1158 = vmatprep.subr.bf16.mxu0 %v1312_v17  ;;  %1172 = vmatprep.mubr.msk.bf16.mxu0 %vm1313_vm0, %v1312_v17 }
  0x57   :  { %1192 = vmatprep.mubr.msk.bf16.mxu1 %vm1313_vm0, %v1312_v17  ;;  %1177 = vmatpush3.bf16.msra.mxu1 %v1273_v25 }
  0x58   :  { %1178 = vmatprep.subr.bf16.mxu1 %v1312_v17 }
  0x59   :  { %1159 = vmatpush3.bf16.msra.mxu0 %v1266_v18 }
  0x5a   :  { %1160 = vmatprep.subr.bf16.mxu0 %v1312_v17 }
  0x5b   :  { %1179 = vmatpush3.bf16.msra.mxu1 %v1274_v26 }
  0x5c   :  { %1180 = vmatprep.subr.bf16.mxu1 %v1312_v17 }
  0x5d   :  { %1161 = vmatpush3.bf16.msra.mxu0 %v1267_v19 }
  0x5e   :  { %1162 = vmatprep.subr.bf16.mxu0 %v1312_v17 }
  0x5f   :  { %1181 = vmatpush3.bf16.msra.mxu1 %v1275_v27 }
  0x60   :  { %1182 = vmatprep.subr.bf16.mxu1 %v1312_v17 }
  0x61   :  { %1163 = vmatpush3.bf16.msra.mxu0 %v1268_v20 }
  0x62   :  { %1164 = vmatprep.subr.bf16.mxu0 %v1312_v17 }
  0x63   :  { %1183 = vmatpush3.bf16.msra.mxu1 %v1276_v28 }
  0x64   :  { %1184 = vmatprep.subr.bf16.mxu1 %v1312_v17 }
  0x65   :  { %1165 = vmatpush3.bf16.msra.mxu0 %v1269_v21 }
  0x66   :  { %1166 = vmatprep.subr.bf16.mxu0 %v1312_v17 }
  0x67   :  { %1185 = vmatpush3.bf16.msra.mxu1 %v1277_v29 }
  0x68   :  { %1186 = vmatprep.subr.bf16.mxu1 %v1312_v17 }
  0x69   :  { %1167 = vmatpush3.bf16.msra.mxu0 %v1270_v22 }
  0x6a   :  { %1168 = vmatprep.subr.bf16.mxu0 %v1312_v17 }
  0x6b   :  { %1187 = vmatpush3.bf16.msra.mxu1 %v1278_v30 }
  0x6c   :  { %1188 = vmatprep.subr.bf16.mxu1 %v1312_v17 }
  0x6d   :  { %1169 = vmatpush3.bf16.msra.mxu0 %v1271_v23 }
  0x6e   :  { %1170 = vmatprep.subr.bf16.mxu0 %v1312_v17 }
  0x6f   :  { %1189 = vmatpush3.bf16.msra.mxu1 %v1279_v62 }
  0x70   :  { %1190 = vmatprep.subr.bf16.mxu1 %v1312_v17 }
  0x71   :  { %1171 = vmatpush3.bf16.msra.mxu0 %v1272_v24 }
  0x73   :  { %1191 = vmatpush3.bf16.msra.mxu1 %v1280_v63 }
 0x107   :  { %v1066_v35 = vpop.f32.mrb[0].mxu0 }
 0x108   :  { %v1088_v36 = vpop.f32.mrb[0].mxu1  ;;  %v1067_v38 = vpop.f32.mrb[1].mxu0 }
 0x109   :  { %v1089_v39 = vpop.f32.mrb[1].mxu1  ;;  %v1068_v40 = vadd.f32 %v1067_v38, %v1066_v35  ;;  %v1069_v42 = vpop.f32.mrb[2].mxu0 }
 0x10a   :  { %v1090_v41 = vadd.f32 %v1089_v39, %v1088_v36  ;;  %v1091_v43 = vpop.f32.mrb[2].mxu1  ;;  %v1070_v44 = vpop.f32.mrb[3].mxu0 }
 0x10b   :  { %v1092_v45 = vpop.f32.mrb[3].mxu1  ;;  %v603_v46 = vadd.f32 %v1068_v40, %v183_v37 }
 0x10d   :  { %v643_v47 = vadd.f32 %v1090_v41, %v603_v46 }
 0x127   :  { %v1110_v48 = vpop.f32.mrb[4].mxu0 }
 0x128   :  { %v1132_v49 = vpop.f32.mrb[4].mxu1  ;;  %v1111_v50 = vpop.f32.mrb[5].mxu0 }
 0x129   :  { %v1112_v51 = vadd.f32 %v1111_v50, %v1110_v48  ;;  %v1133_v52 = vpop.f32.mrb[5].mxu1  ;;  %v1113_v53 = vpop.f32.mrb[6].mxu0 }
 0x12a   :  { %v1134_v54 = vadd.f32 %v1133_v52, %v1132_v49  ;;  %v1135_v55 = vpop.f32.mrb[6].mxu1  ;;  %v1114_v56 = vpop.f32.mrb[7].mxu0 }
 0x12b   :  { %v683_v57 = vadd.f32 %v1112_v51, %v643_v47  ;;  %v1136_v58 = vpop.f32.mrb[7].mxu1 }
 0x12d   :  { %v723_v59 = vadd.f32 %v1134_v54, %v683_v57 }
 0x12f   :  { %v728_v60 = vmax.f32 %v723_v59, 0.0 }
 0x131   :  { %v729_v61 = vpack.c.bf16 %v728_v60, %v728_v60 }
 0x133   :  { %1173 = vmatmul.mubr.bf16.vlgmr.msra.gmra.mrb[8].mxu0 %v729_v61 }
 0x206   :  { %v832_v2 = vpop.f32.mrb[8].mxu0 }
 0x207   :  { %v833_v3 = vadd.f32 %v832_v2, %v749_v1  ;;  %v1174_v4 = vpop.f32.mrb[9].mxu0 }
 0x208   :  { %v835_v5 = vpop.f32.mrb[10].mxu0 }
 0x209   :  { %v838_v6 = vmax.f32 %v833_v3, 0.0  ;;  %v1175_v7 = vpop.f32.mrb[11].mxu0 }
 0x20b   :  { %v839_v8 = vpack.c.bf16 %v838_v6, %v838_v6 }
 0x20d   :  { %1193 = vmatmul.mubr.bf16.vlgmr.msra.gmra.mrb[8].mxu1 %v839_v8 }
 0x2e0   :  { %v942_v12 = vpop.f32.mrb[8].mxu1 }
 0x2e1   :  { %v943_v13 = vadd.f32 %v942_v12, %v859_v11  ;;  %v1194_v14 = vpop.f32.mrb[9].mxu1 }
 0x2e2   :  { %v945_v15 = vpop.f32.mrb[10].mxu1 }
 0x2e3   :  { %v1195_v16 = vpop.f32.mrb[11].mxu1  ;;  %v951_v17 = vsel %vm950_vm1, %v943_v13, -inf }
 0x2e4   :  { %952 = vmax.xlane.f32.xlu0 %v951_v17 }
 0x371   :  { %v953_v18 = vpop.xlane.xlu0 %952 }
 0x372   :  { %v954_v19 = vsub.f32 %v951_v17, %v953_v18 }
 0x374   :  { %v955_v20 = vmul.f32 1.442695, %v954_v19 }
 0x376   :  { %1281 = vpow2.f32 %v955_v20 }
 0x380   :  { %v1282_v21 = vpop.eup %1281 }
 0x381   :  { %957 = vadd.xlane.f32.xlu0 %v1282_v21 }
 0x40e   :  { %v958_v22 = vpop.xlane.xlu0 %957 }
 0x40f   :  { %1283 = vlog2.f32 %v958_v22 }
 0x419   :  { %v1284_v23 = vpop.eup %1283 }
 0x41a   :  { %v960_v24 = vmul.f32 0.6931472, %v1284_v23 }
 0x41c   :  { %v961_v25 = vsub.f32 %v954_v19, %v960_v24 }
 0x41e   :  { %v962_v26 = vsel %vm950_vm1, %v961_v25, 0.0 }
 0x41f   :  { %v963_v27 = vpack.c.bf16 %v962_v26, %v962_v26 }
 0x421   :  { %964 = vst [vmem:[%s1459_s5] sm:$0xf] %v963_v27 }
 0x422   :  { %969 = vsyncpa [#allocation3], 1 }

</bundles_post_ra>
